<compile_context>
chip_gen: v7x
topology: tpu7x:2x2x1
jax: 0.10.0
libtpu: 0.0.40
codegen_flags: <defaults>
</compile_context>

<pallas_src>
import functools

import jax
import jax.numpy as jnp
from jax.experimental import pallas as pl
from jax.experimental.pallas import tpu as pltpu


# ----------------------------- kernel ---------------------------------------


def _layernorm(x, gamma, beta, eps=1e-5):
    mean = jnp.mean(x, axis=-1, keepdims=True)
    var = jnp.mean((x - mean) ** 2, axis=-1, keepdims=True)
    return (x - mean) * jax.lax.rsqrt(var + eps) * gamma + beta


def fused_encoder_kernel(
    x_ref, pe_ref,
    wqkv_ref, bqkv_ref, wo_ref, bo_ref,
    w1_ref, b1_ref, w2_ref, b2_ref,
    g1_ref, be1_ref, g2_ref, be2_ref,
    o_ref,
    act_ref,
    *, num_heads,
):
    l = pl.program_id(1)
    n_layers = pl.num_programs(1)

    # Layer 0: pull the activation in once and fold in the positional encoding.
    @pl.when(l == 0)
    def _():
        act_ref[...] = x_ref[0].astype(jnp.float32) + pe_ref[...]

    x = act_ref[...]                                  # (T, C) f32, VMEM-resident
    T, C = x.shape
    dh = C // num_heads
    scale = 1.0 / (dh ** 0.5)

    xb = x.astype(jnp.bfloat16)

    # ---- multi-head self-attention -----------------------------------------
    # One fused QKV matmul on the MXU (bf16 in, f32 accumulate).
    qkv = (jnp.dot(xb, wqkv_ref[0], preferred_element_type=jnp.float32)
           + bqkv_ref[0])                             # (T, 3C) f32
    q = qkv[:, :C] * scale
    k = qkv[:, C:2 * C]
    v = qkv[:, 2 * C:]

    # Head-batched (H, T, dh) views; subsequent contractions are batched over
    # the head axis (no per-head matmuls, no lane-axis concatenate).
    qh = jnp.stack([q[:, h * dh:(h + 1) * dh] for h in range(num_heads)],
                   axis=0).astype(jnp.bfloat16)
    kh = jnp.stack([k[:, h * dh:(h + 1) * dh] for h in range(num_heads)],
                   axis=0).astype(jnp.bfloat16)
    vh = jnp.stack([v[:, h * dh:(h + 1) * dh] for h in range(num_heads)],
                   axis=0).astype(jnp.bfloat16)

    s = jnp.einsum('htd,hsd->hts', qh, kh,
                   preferred_element_type=jnp.float32)            # (H, T, T)
    s = s - jnp.max(s, axis=-1, keepdims=True)
    p = jnp.exp(s)
    p = p * pl.reciprocal(jnp.sum(p, axis=-1, keepdims=True), approx=True)

    o_heads = jnp.einsum('hts,hsd->htd', p.astype(jnp.bfloat16), vh,
                         preferred_element_type=jnp.float32)      # (H, T, dh)

    # Output projection applied per head, reduced over heads (== concat @ Wo).
    proj = jnp.einsum('htd,hdc->htc', o_heads.astype(jnp.bfloat16), wo_ref[0],
                      preferred_element_type=jnp.float32)         # (H, T, C)
    attn = jnp.sum(proj, axis=0) + bo_ref[0]                      # (T, C)

    x1 = _layernorm(x + attn, g1_ref[0], be1_ref[0])

    # ---- feed-forward -------------------------------------------------------
    h1 = (jnp.dot(x1.astype(jnp.bfloat16), w1_ref[0],
                  preferred_element_type=jnp.float32) + b1_ref[0])
    h1 = jnp.maximum(h1, 0.0)                                     # ReLU
    ffn = (jnp.dot(h1.astype(jnp.bfloat16), w2_ref[0],
                   preferred_element_type=jnp.float32) + b2_ref[0])

    x2 = _layernorm(x1 + ffn, g2_ref[0], be2_ref[0])

    act_ref[...] = x2                                 # carry to next layer

    @pl.when(l == n_layers - 1)
    def _():
        o_ref[0] = x2.astype(o_ref.dtype)


# ----------------------------- wrapper ---------------------------------------


def transformer_encoder(x, stacked, pe, num_heads):
    """x: (B, T, C); stacked: dict of (L, ...) stacked per-layer weights."""
    B, T, C = x.shape
    L = stacked["wqkv"].shape[0]

    weight_order = ["wqkv", "bqkv", "wo", "bo",
                    "w1", "b1", "w2", "b2",
                    "g1", "be1", "g2", "be2"]
    weights = [stacked[k] for k in weight_order]

    def wspec(arr):
        ndim = arr.ndim
        block = (1,) + arr.shape[1:]
        return pl.BlockSpec(block, lambda b, l, _n=ndim: (l,) + (0,) * (_n - 1))

    in_specs = (
        [pl.BlockSpec((1, T, C), lambda b, l: (b, 0, 0)),   # activation
         pl.BlockSpec((T, C), lambda b, l: (0, 0))]         # positional enc.
        + [wspec(w) for w in weights]
    )

    return pl.pallas_call(
        functools.partial(fused_encoder_kernel, num_heads=num_heads),
        out_shape=jax.ShapeDtypeStruct((B, T, C), x.dtype),
        grid=(B, L),
        in_specs=in_specs,
        out_specs=pl.BlockSpec((1, T, C), lambda b, l: (b, 0, 0)),
        scratch_shapes=[pltpu.VMEM((T, C), jnp.float32)],
        compiler_params=pltpu.CompilerParams(
            dimension_semantics=("parallel", "arbitrary")),
    )(x, pe, *weights)


# ----------------------------- param / PE setup ------------------------------


def sinusoidal_pe(T, C):
    pos = jnp.arange(T, dtype=jnp.float32)[:, None]
    i = jnp.arange(0, C, 2, dtype=jnp.float32)[None, :]
    div = jnp.exp(-(i / C) * jnp.log(10000.0))
    pe = jnp.zeros((T, C), jnp.float32)
    pe = pe.at[:, 0::2].set(jnp.sin(pos * div))
    pe = pe.at[:, 1::2].set(jnp.cos(pos * div))
    return pe


def init_layer_params(key, C, F):
    ks = jax.random.split(key, 6)

    def xavier(k, shape):
        fan_in, fan_out = shape
        lim = (6.0 / (fan_in + fan_out)) ** 0.5
        return jax.random.uniform(k, shape, jnp.float32, -lim, lim)

    return {
        "wq": xavier(ks[0], (C, C)), "bq": jnp.zeros((1, C), jnp.float32),
        "wk": xavier(ks[1], (C, C)), "bk": jnp.zeros((1, C), jnp.float32),
        "wv": xavier(ks[2], (C, C)), "bv": jnp.zeros((1, C), jnp.float32),
        "wo": xavier(ks[3], (C, C)), "bo": jnp.zeros((1, C), jnp.float32),
        "w1": xavier(ks[4], (C, F)), "b1": jnp.zeros((1, F), jnp.float32),
        "w2": xavier(ks[5], (F, C)), "b2": jnp.zeros((1, C), jnp.float32),
        "g1": jnp.ones((1, C), jnp.float32), "be1": jnp.zeros((1, C), jnp.float32),
        "g2": jnp.ones((1, C), jnp.float32), "be2": jnp.zeros((1, C), jnp.float32),
    }


def stack_layer_params(layer_params, num_heads):
    """Stack per-layer weights to (L, ...). Matmul weights cast to bf16,
    biases / layernorm params stay f32 (added to f32 accumulates)."""
    C = layer_params[0]["wq"].shape[0]
    dh = C // num_heads

    def per_layer(p):
        wqkv = jnp.concatenate([p["wq"], p["wk"], p["wv"]], axis=1)
        bqkv = jnp.concatenate([p["bq"], p["bk"], p["bv"]], axis=1)
        return {
            "wqkv": wqkv.astype(jnp.bfloat16),                 # (C, 3C)
            "bqkv": bqkv,                                      # (1, 3C)
            "wo": p["wo"].reshape(num_heads, dh, C).astype(jnp.bfloat16),
            "bo": p["bo"],
            "w1": p["w1"].astype(jnp.bfloat16), "b1": p["b1"],
            "w2": p["w2"].astype(jnp.bfloat16), "b2": p["b2"],
            "g1": p["g1"], "be1": p["be1"], "g2": p["g2"], "be2": p["be2"],
        }

    per = [per_layer(p) for p in layer_params]
    return {k: jnp.stack([pl_[k] for pl_ in per], axis=0) for k in per[0]}


# ----------------------------- main ------------------------------------------

if __name__ == "__main__":
    B, T, C = 2, 8, 32          # batch, seq len, model dim
    NUM_HEADS = 4
    FFN_DIM = 64
    NUM_LAYERS = 2

    key = jax.random.PRNGKey(0)
    k_x, k_p = jax.random.split(key)
    x = jax.random.normal(k_x, (B, T, C), jnp.float32)

    layer_keys = jax.random.split(k_p, NUM_LAYERS)
    layer_params = [init_layer_params(k, C, FFN_DIM) for k in layer_keys]
    stacked = stack_layer_params(layer_params, NUM_HEADS)
    pe = sinusoidal_pe(T, C)

    # src_mask=None path (no mask applied), as in the module's forward.
    out = transformer_encoder(x, stacked, pe, NUM_HEADS)
    jax.block_until_ready(out)

    assert out.shape == (B, T, C)
    assert bool(jnp.all(jnp.isfinite(out)))
    print("KERNEL_OK")
</pallas_src>

<mosaic_0001>
module attributes {stable_mosaic.version = 11 : i64} {
  func.func @fused_encoder_kernel(%arg0: i32, %arg1: i32, %arg2: memref<1x8x32xf32, #tpu.memory_space<vmem>>, %arg3: memref<8x32xf32, #tpu.memory_space<vmem>>, %arg4: memref<1x32x96xbf16, #tpu.memory_space<vmem>>, %arg5: memref<1x1x96xf32, #tpu.memory_space<vmem>>, %arg6: memref<1x4x8x32xbf16, #tpu.memory_space<vmem>>, %arg7: memref<1x1x32xf32, #tpu.memory_space<vmem>>, %arg8: memref<1x32x64xbf16, #tpu.memory_space<vmem>>, %arg9: memref<1x1x64xf32, #tpu.memory_space<vmem>>, %arg10: memref<1x64x32xbf16, #tpu.memory_space<vmem>>, %arg11: memref<1x1x32xf32, #tpu.memory_space<vmem>>, %arg12: memref<1x1x32xf32, #tpu.memory_space<vmem>>, %arg13: memref<1x1x32xf32, #tpu.memory_space<vmem>>, %arg14: memref<1x1x32xf32, #tpu.memory_space<vmem>>, %arg15: memref<1x1x32xf32, #tpu.memory_space<vmem>>, %arg16: memref<1x8x32xf32, #tpu.memory_space<vmem>>, %arg17: memref<8x32xf32, #tpu.memory_space<vmem>>) attributes {dimension_semantics = [#tpu.dimension_semantics<parallel>, #tpu.dimension_semantics<arbitrary>], iteration_bounds = array<i64: 2, 2>, scalar_prefetch = 0 : i64, scratch_operands = 1 : i64, tpu.core_type = #tpu.core_type<tc>, window_params = [{transform_indices = @transform_0, window_bounds = array<i64: 1, 8, 32>}, {pipeline_mode = #tpu.pipeline_mode<synchronous>, transform_indices = @transform_1, window_bounds = array<i64: 8, 32>}, {transform_indices = @transform_2, window_bounds = array<i64: 1, 32, 96>}, {transform_indices = @transform_3, window_bounds = array<i64: 1, 1, 96>}, {transform_indices = @transform_4, window_bounds = array<i64: 1, 4, 8, 32>}, {transform_indices = @transform_5, window_bounds = array<i64: 1, 1, 32>}, {transform_indices = @transform_6, window_bounds = array<i64: 1, 32, 64>}, {transform_indices = @transform_7, window_bounds = array<i64: 1, 1, 64>}, {transform_indices = @transform_8, window_bounds = array<i64: 1, 64, 32>}, {transform_indices = @transform_9, window_bounds = array<i64: 1, 1, 32>}, {transform_indices = @transform_10, window_bounds = array<i64: 1, 1, 32>}, {transform_indices = @transform_11, window_bounds = array<i64: 1, 1, 32>}, {transform_indices = @transform_12, window_bounds = array<i64: 1, 1, 32>}, {transform_indices = @transform_13, window_bounds = array<i64: 1, 1, 32>}, {transform_indices = @transform_14, window_bounds = array<i64: 1, 8, 32>}]} {
    %c0_i32 = arith.constant 0 : i32
    %0 = arith.cmpi eq, %arg1, %c0_i32 : i32
    %1 = arith.extui %0 : i1 to i32
    %c0_i32_0 = arith.constant 0 : i32
    %2 = arith.cmpi ne, %1, %c0_i32_0 : i32
    scf.if %2 {
      %c0_62 = arith.constant 0 : index
      %c0_63 = arith.constant 0 : index
      %c0_64 = arith.constant 0 : index
      %145 = vector.load %arg2[%c0_62, %c0_63, %c0_64] : memref<1x8x32xf32, #tpu.memory_space<vmem>>, vector<1x8x32xf32>
      %146 = vector.shape_cast %145 : vector<1x8x32xf32> to vector<8x32xf32>
      %c0_65 = arith.constant 0 : index
      %c0_66 = arith.constant 0 : index
      %147 = vector.load %arg3[%c0_65, %c0_66] : memref<8x32xf32, #tpu.memory_space<vmem>>, vector<8x32xf32>
      %148 = arith.addf %146, %147 : vector<8x32xf32>
      %c0_67 = arith.constant 0 : index
      %c0_68 = arith.constant 0 : index
      %149 = vector.load %arg17[%c0_67, %c0_68] : memref<8x32xf32, #tpu.memory_space<vmem>>, vector<8x32xf32>
      tpu.vector_store %arg17[%c0_67, %c0_68], %148 {strides = array<i32>} : memref<8x32xf32, #tpu.memory_space<vmem>>, vector<8x32xf32>,
    } else {
    }
    %c0 = arith.constant 0 : index
    %c0_1 = arith.constant 0 : index
    %3 = vector.load %arg17[%c0, %c0_1] : memref<8x32xf32, #tpu.memory_space<vmem>>, vector<8x32xf32>
    %4 = arith.truncf %3 : vector<8x32xf32> to vector<8x32xbf16>
    %c0_2 = arith.constant 0 : index
    %c0_3 = arith.constant 0 : index
    %c0_4 = arith.constant 0 : index
    %5 = vector.load %arg4[%c0_2, %c0_3, %c0_4] : memref<1x32x96xbf16, #tpu.memory_space<vmem>>, vector<1x32x96xbf16>
    %6 = vector.shape_cast %5 : vector<1x32x96xbf16> to vector<32x96xbf16>
    %cst = arith.constant dense<0.000000e+00> : vector<8x96xf32>
    %7 = tpu.matmul %4, %6, %cst {dimension_numbers = #tpu.dot_dimension_numbers<[1], [0], [0], [1], [0, 0, 1, 1], [], []>} : vector<8x32xbf16>, vector<32x96xbf16>, vector<8x96xf32> -> vector<8x96xf32>
    %c0_5 = arith.constant 0 : index
    %c0_6 = arith.constant 0 : index
    %c0_7 = arith.constant 0 : index
    %8 = vector.load %arg5[%c0_5, %c0_6, %c0_7] : memref<1x1x96xf32, #tpu.memory_space<vmem>>, vector<1x1x96xf32>
    %9 = vector.shape_cast %8 : vector<1x1x96xf32> to vector<1x96xf32>
    %10 = vector.broadcast %9 : vector<1x96xf32> to vector<8x96xf32>
    %11 = arith.addf %7, %10 : vector<8x96xf32>
    %12 = vector.extract_strided_slice %11 {offsets = [0, 0], sizes = [8, 32], strides = [1, 1]} : vector<8x96xf32> to vector<8x32xf32>
    %cst_8 = arith.constant 0.353553385 : f32
    %13 = vector.broadcast %cst_8 : f32 to vector<8x32xf32>
    %14 = arith.mulf %12, %13 : vector<8x32xf32>
    %15 = vector.extract_strided_slice %11 {offsets = [0, 32], sizes = [8, 32], strides = [1, 1]} : vector<8x96xf32> to vector<8x32xf32>
    %16 = vector.extract_strided_slice %11 {offsets = [0, 64], sizes = [8, 32], strides = [1, 1]} : vector<8x96xf32> to vector<8x32xf32>
    %17 = vector.extract_strided_slice %14 {offsets = [0, 0], sizes = [8, 8], strides = [1, 1]} : vector<8x32xf32> to vector<8x8xf32>
    %18 = vector.extract_strided_slice %14 {offsets = [0, 8], sizes = [8, 8], strides = [1, 1]} : vector<8x32xf32> to vector<8x8xf32>
    %19 = vector.extract_strided_slice %14 {offsets = [0, 16], sizes = [8, 8], strides = [1, 1]} : vector<8x32xf32> to vector<8x8xf32>
    %20 = vector.extract_strided_slice %14 {offsets = [0, 24], sizes = [8, 8], strides = [1, 1]} : vector<8x32xf32> to vector<8x8xf32>
    %21 = vector.shape_cast %17 : vector<8x8xf32> to vector<1x8x8xf32>
    %22 = vector.shape_cast %18 : vector<8x8xf32> to vector<1x8x8xf32>
    %23 = vector.shape_cast %19 : vector<8x8xf32> to vector<1x8x8xf32>
    %24 = vector.shape_cast %20 : vector<8x8xf32> to vector<1x8x8xf32>
    %25 = tpu.concatenate %21, %22, %23, %24 in 0 : vector<1x8x8xf32>, vector<1x8x8xf32>, vector<1x8x8xf32>, vector<1x8x8xf32> -> vector<4x8x8xf32>
    %26 = arith.truncf %25 : vector<4x8x8xf32> to vector<4x8x8xbf16>
    %27 = vector.extract_strided_slice %15 {offsets = [0, 0], sizes = [8, 8], strides = [1, 1]} : vector<8x32xf32> to vector<8x8xf32>
    %28 = vector.extract_strided_slice %15 {offsets = [0, 8], sizes = [8, 8], strides = [1, 1]} : vector<8x32xf32> to vector<8x8xf32>
    %29 = vector.extract_strided_slice %15 {offsets = [0, 16], sizes = [8, 8], strides = [1, 1]} : vector<8x32xf32> to vector<8x8xf32>
    %30 = vector.extract_strided_slice %15 {offsets = [0, 24], sizes = [8, 8], strides = [1, 1]} : vector<8x32xf32> to vector<8x8xf32>
    %31 = vector.shape_cast %27 : vector<8x8xf32> to vector<1x8x8xf32>
    %32 = vector.shape_cast %28 : vector<8x8xf32> to vector<1x8x8xf32>
    %33 = vector.shape_cast %29 : vector<8x8xf32> to vector<1x8x8xf32>
    %34 = vector.shape_cast %30 : vector<8x8xf32> to vector<1x8x8xf32>
    %35 = tpu.concatenate %31, %32, %33, %34 in 0 : vector<1x8x8xf32>, vector<1x8x8xf32>, vector<1x8x8xf32>, vector<1x8x8xf32> -> vector<4x8x8xf32>
    %36 = arith.truncf %35 : vector<4x8x8xf32> to vector<4x8x8xbf16>
    %37 = vector.extract_strided_slice %16 {offsets = [0, 0], sizes = [8, 8], strides = [1, 1]} : vector<8x32xf32> to vector<8x8xf32>
    %38 = vector.extract_strided_slice %16 {offsets = [0, 8], sizes = [8, 8], strides = [1, 1]} : vector<8x32xf32> to vector<8x8xf32>
    %39 = vector.extract_strided_slice %16 {offsets = [0, 16], sizes = [8, 8], strides = [1, 1]} : vector<8x32xf32> to vector<8x8xf32>
    %40 = vector.extract_strided_slice %16 {offsets = [0, 24], sizes = [8, 8], strides = [1, 1]} : vector<8x32xf32> to vector<8x8xf32>
    %41 = vector.shape_cast %37 : vector<8x8xf32> to vector<1x8x8xf32>
    %42 = vector.shape_cast %38 : vector<8x8xf32> to vector<1x8x8xf32>
    %43 = vector.shape_cast %39 : vector<8x8xf32> to vector<1x8x8xf32>
    %44 = vector.shape_cast %40 : vector<8x8xf32> to vector<1x8x8xf32>
    %45 = tpu.concatenate %41, %42, %43, %44 in 0 : vector<1x8x8xf32>, vector<1x8x8xf32>, vector<1x8x8xf32>, vector<1x8x8xf32> -> vector<4x8x8xf32>
    %46 = arith.truncf %45 : vector<4x8x8xf32> to vector<4x8x8xbf16>
    "tpu.trace_start"() <{level = 10 : i32, message = "htd,hsd->hts"}> : () -> ()
    %cst_9 = arith.constant dense<0.000000e+00> : vector<4x8x8xf32>
    %47 = tpu.matmul %26, %36, %cst_9 {dimension_numbers = #tpu.dot_dimension_numbers<[2], [2], [1], [1], [0, 0, 0, 1, 1, 1], [0], [0]>} : vector<4x8x8xbf16>, vector<4x8x8xbf16>, vector<4x8x8xf32> -> vector<4x8x8xf32>
    "tpu.trace_stop"() : () -> ()
    %cst_10 = arith.constant dense<0xFF800000> : vector<4x8xf32>
    %48 = vector.multi_reduction <maximumf>, %47, %cst_10 [2] : vector<4x8x8xf32> to vector<4x8xf32>
    %49 = vector.shape_cast %48 : vector<4x8xf32> to vector<4x8x1xf32>
    %50 = vector.broadcast %49 : vector<4x8x1xf32> to vector<4x8x8xf32>
    %51 = arith.subf %47, %50 : vector<4x8x8xf32>
    %52 = math.exp %51 : vector<4x8x8xf32>
    %cst_11 = arith.constant dense<0.000000e+00> : vector<4x8xf32>
    %53 = vector.multi_reduction <add>, %52, %cst_11 [2] : vector<4x8x8xf32> to vector<4x8xf32>
    %54 = vector.shape_cast %53 : vector<4x8xf32> to vector<4x8x1xf32>
    %55 = tpu.reciprocal %54 {approx = true} : vector<4x8x1xf32> -> vector<4x8x1xf32>
    %56 = vector.broadcast %55 : vector<4x8x1xf32> to vector<4x8x8xf32>
    %57 = arith.mulf %52, %56 : vector<4x8x8xf32>
    %58 = arith.truncf %57 : vector<4x8x8xf32> to vector<4x8x8xbf16>
    "tpu.trace_start"() <{level = 10 : i32, message = "hts,hsd->htd"}> : () -> ()
    %cst_12 = arith.constant dense<0.000000e+00> : vector<4x8x8xf32>
    %59 = tpu.matmul %58, %46, %cst_12 {dimension_numbers = #tpu.dot_dimension_numbers<[2], [1], [1], [2], [0, 0, 0, 1, 1, 2], [0], [0]>} : vector<4x8x8xbf16>, vector<4x8x8xbf16>, vector<4x8x8xf32> -> vector<4x8x8xf32>
    "tpu.trace_stop"() : () -> ()
    %60 = arith.truncf %59 : vector<4x8x8xf32> to vector<4x8x8xbf16>
    %c0_13 = arith.constant 0 : index
    %c0_14 = arith.constant 0 : index
    %c0_15 = arith.constant 0 : index
    %c0_16 = arith.constant 0 : index
    %61 = vector.load %arg6[%c0_13, %c0_14, %c0_15, %c0_16] : memref<1x4x8x32xbf16, #tpu.memory_space<vmem>>, vector<1x4x8x32xbf16>
    %62 = vector.shape_cast %61 : vector<1x4x8x32xbf16> to vector<4x8x32xbf16>
    "tpu.trace_start"() <{level = 10 : i32, message = "htd,hdc->htc"}> : () -> ()
    %cst_17 = arith.constant dense<0.000000e+00> : vector<4x8x32xf32>
    %63 = tpu.matmul %60, %62, %cst_17 {dimension_numbers = #tpu.dot_dimension_numbers<[2], [1], [1], [2], [0, 0, 0, 1, 1, 2], [0], [0]>} : vector<4x8x8xbf16>, vector<4x8x32xbf16>, vector<4x8x32xf32> -> vector<4x8x32xf32>
    "tpu.trace_stop"() : () -> ()
    %cst_18 = arith.constant dense<0.000000e+00> : vector<8x32xf32>
    %64 = vector.multi_reduction <add>, %63, %cst_18 [0] : vector<4x8x32xf32> to vector<8x32xf32>
    %c0_19 = arith.constant 0 : index
    %c0_20 = arith.constant 0 : index
    %c0_21 = arith.constant 0 : index
    %65 = vector.load %arg7[%c0_19, %c0_20, %c0_21] : memref<1x1x32xf32, #tpu.memory_space<vmem>>, vector<1x1x32xf32>
    %66 = vector.shape_cast %65 : vector<1x1x32xf32> to vector<1x32xf32>
    %67 = vector.broadcast %66 : vector<1x32xf32> to vector<8x32xf32>
    %68 = arith.addf %64, %67 : vector<8x32xf32>
    %69 = arith.addf %3, %68 : vector<8x32xf32>
    %c0_22 = arith.constant 0 : index
    %c0_23 = arith.constant 0 : index
    %c0_24 = arith.constant 0 : index
    %70 = vector.load %arg12[%c0_22, %c0_23, %c0_24] : memref<1x1x32xf32, #tpu.memory_space<vmem>>, vector<1x1x32xf32>
    %71 = vector.shape_cast %70 : vector<1x1x32xf32> to vector<1x32xf32>
    %c0_25 = arith.constant 0 : index
    %c0_26 = arith.constant 0 : index
    %c0_27 = arith.constant 0 : index
    %72 = vector.load %arg13[%c0_25, %c0_26, %c0_27] : memref<1x1x32xf32, #tpu.memory_space<vmem>>, vector<1x1x32xf32>
    %73 = vector.shape_cast %72 : vector<1x1x32xf32> to vector<1x32xf32>
    %cst_28 = arith.constant dense<0.000000e+00> : vector<8xf32>
    %74 = vector.multi_reduction <add>, %69, %cst_28 [1] : vector<8x32xf32> to vector<8xf32>
    %75 = vector.shape_cast %74 : vector<8xf32> to vector<8x1xf32>
    %cst_29 = arith.constant 3.200000e+01 : f32
    %76 = vector.broadcast %cst_29 : f32 to vector<8x1xf32>
    %77 = arith.divf %75, %76 : vector<8x1xf32>
    %78 = vector.broadcast %77 : vector<8x1xf32> to vector<8x32xf32>
    %79 = arith.subf %69, %78 : vector<8x32xf32>
    %80 = arith.mulf %79, %79 : vector<8x32xf32>
    %cst_30 = arith.constant dense<0.000000e+00> : vector<8xf32>
    %81 = vector.multi_reduction <add>, %80, %cst_30 [1] : vector<8x32xf32> to vector<8xf32>
    %82 = vector.shape_cast %81 : vector<8xf32> to vector<8x1xf32>
    %cst_31 = arith.constant 3.200000e+01 : f32
    %83 = vector.broadcast %cst_31 : f32 to vector<8x1xf32>
    %84 = arith.divf %82, %83 : vector<8x1xf32>
    %85 = vector.broadcast %77 : vector<8x1xf32> to vector<8x32xf32>
    %86 = arith.subf %69, %85 : vector<8x32xf32>
    %cst_32 = arith.constant 9.99999974E-6 : f32
    %87 = vector.broadcast %cst_32 : f32 to vector<8x1xf32>
    %88 = arith.addf %84, %87 : vector<8x1xf32>
    %89 = math.rsqrt %88 : vector<8x1xf32>
    %90 = vector.broadcast %89 : vector<8x1xf32> to vector<8x32xf32>
    %91 = arith.mulf %86, %90 : vector<8x32xf32>
    %92 = vector.broadcast %71 : vector<1x32xf32> to vector<8x32xf32>
    %93 = arith.mulf %91, %92 : vector<8x32xf32>
    %94 = vector.broadcast %73 : vector<1x32xf32> to vector<8x32xf32>
    %95 = arith.addf %93, %94 : vector<8x32xf32>
    %96 = arith.truncf %95 : vector<8x32xf32> to vector<8x32xbf16>
    %c0_33 = arith.constant 0 : index
    %c0_34 = arith.constant 0 : index
    %c0_35 = arith.constant 0 : index
    %97 = vector.load %arg8[%c0_33, %c0_34, %c0_35] : memref<1x32x64xbf16, #tpu.memory_space<vmem>>, vector<1x32x64xbf16>
    %98 = vector.shape_cast %97 : vector<1x32x64xbf16> to vector<32x64xbf16>
    %cst_36 = arith.constant dense<0.000000e+00> : vector<8x64xf32>
    %99 = tpu.matmul %96, %98, %cst_36 {dimension_numbers = #tpu.dot_dimension_numbers<[1], [0], [0], [1], [0, 0, 1, 1], [], []>} : vector<8x32xbf16>, vector<32x64xbf16>, vector<8x64xf32> -> vector<8x64xf32>
    %c0_37 = arith.constant 0 : index
    %c0_38 = arith.constant 0 : index
    %c0_39 = arith.constant 0 : index
    %100 = vector.load %arg9[%c0_37, %c0_38, %c0_39] : memref<1x1x64xf32, #tpu.memory_space<vmem>>, vector<1x1x64xf32>
    %101 = vector.shape_cast %100 : vector<1x1x64xf32> to vector<1x64xf32>
    %102 = vector.broadcast %101 : vector<1x64xf32> to vector<8x64xf32>
    %103 = arith.addf %99, %102 : vector<8x64xf32>
    %cst_40 = arith.constant 0.000000e+00 : f32
    %104 = vector.broadcast %cst_40 : f32 to vector<8x64xf32>
    %105 = arith.maximumf %103, %104 : vector<8x64xf32>
    %106 = arith.truncf %105 : vector<8x64xf32> to vector<8x64xbf16>
    %c0_41 = arith.constant 0 : index
    %c0_42 = arith.constant 0 : index
    %c0_43 = arith.constant 0 : index
    %107 = vector.load %arg10[%c0_41, %c0_42, %c0_43] : memref<1x64x32xbf16, #tpu.memory_space<vmem>>, vector<1x64x32xbf16>
    %108 = vector.shape_cast %107 : vector<1x64x32xbf16> to vector<64x32xbf16>
    %cst_44 = arith.constant dense<0.000000e+00> : vector<8x32xf32>
    %109 = tpu.matmul %106, %108, %cst_44 {dimension_numbers = #tpu.dot_dimension_numbers<[1], [0], [0], [1], [0, 0, 1, 1], [], []>} : vector<8x64xbf16>, vector<64x32xbf16>, vector<8x32xf32> -> vector<8x32xf32>
    %c0_45 = arith.constant 0 : index
    %c0_46 = arith.constant 0 : index
    %c0_47 = arith.constant 0 : index
    %110 = vector.load %arg11[%c0_45, %c0_46, %c0_47] : memref<1x1x32xf32, #tpu.memory_space<vmem>>, vector<1x1x32xf32>
    %111 = vector.shape_cast %110 : vector<1x1x32xf32> to vector<1x32xf32>
    %112 = vector.broadcast %111 : vector<1x32xf32> to vector<8x32xf32>
    %113 = arith.addf %109, %112 : vector<8x32xf32>
    %114 = arith.addf %95, %113 : vector<8x32xf32>
    %c0_48 = arith.constant 0 : index
    %c0_49 = arith.constant 0 : index
    %c0_50 = arith.constant 0 : index
    %115 = vector.load %arg14[%c0_48, %c0_49, %c0_50] : memref<1x1x32xf32, #tpu.memory_space<vmem>>, vector<1x1x32xf32>
    %116 = vector.shape_cast %115 : vector<1x1x32xf32> to vector<1x32xf32>
    %c0_51 = arith.constant 0 : index
    %c0_52 = arith.constant 0 : index
    %c0_53 = arith.constant 0 : index
    %117 = vector.load %arg15[%c0_51, %c0_52, %c0_53] : memref<1x1x32xf32, #tpu.memory_space<vmem>>, vector<1x1x32xf32>
    %118 = vector.shape_cast %117 : vector<1x1x32xf32> to vector<1x32xf32>
    %cst_54 = arith.constant dense<0.000000e+00> : vector<8xf32>
    %119 = vector.multi_reduction <add>, %114, %cst_54 [1] : vector<8x32xf32> to vector<8xf32>
    %120 = vector.shape_cast %119 : vector<8xf32> to vector<8x1xf32>
    %cst_55 = arith.constant 3.200000e+01 : f32
    %121 = vector.broadcast %cst_55 : f32 to vector<8x1xf32>
    %122 = arith.divf %120, %121 : vector<8x1xf32>
    %123 = vector.broadcast %122 : vector<8x1xf32> to vector<8x32xf32>
    %124 = arith.subf %114, %123 : vector<8x32xf32>
    %125 = arith.mulf %124, %124 : vector<8x32xf32>
    %cst_56 = arith.constant dense<0.000000e+00> : vector<8xf32>
    %126 = vector.multi_reduction <add>, %125, %cst_56 [1] : vector<8x32xf32> to vector<8xf32>
    %127 = vector.shape_cast %126 : vector<8xf32> to vector<8x1xf32>
    %cst_57 = arith.constant 3.200000e+01 : f32
    %128 = vector.broadcast %cst_57 : f32 to vector<8x1xf32>
    %129 = arith.divf %127, %128 : vector<8x1xf32>
    %130 = vector.broadcast %122 : vector<8x1xf32> to vector<8x32xf32>
    %131 = arith.subf %114, %130 : vector<8x32xf32>
    %cst_58 = arith.constant 9.99999974E-6 : f32
    %132 = vector.broadcast %cst_58 : f32 to vector<8x1xf32>
    %133 = arith.addf %129, %132 : vector<8x1xf32>
    %134 = math.rsqrt %133 : vector<8x1xf32>
    %135 = vector.broadcast %134 : vector<8x1xf32> to vector<8x32xf32>
    %136 = arith.mulf %131, %135 : vector<8x32xf32>
    %137 = vector.broadcast %116 : vector<1x32xf32> to vector<8x32xf32>
    %138 = arith.mulf %136, %137 : vector<8x32xf32>
    %139 = vector.broadcast %118 : vector<1x32xf32> to vector<8x32xf32>
    %140 = arith.addf %138, %139 : vector<8x32xf32>
    %c0_59 = arith.constant 0 : index
    %c0_60 = arith.constant 0 : index
    %141 = vector.load %arg17[%c0_59, %c0_60] : memref<8x32xf32, #tpu.memory_space<vmem>>, vector<8x32xf32>
    tpu.vector_store %arg17[%c0_59, %c0_60], %140 {strides = array<i32>} : memref<8x32xf32, #tpu.memory_space<vmem>>, vector<8x32xf32>,
    %c1_i32 = arith.constant 1 : i32
    %142 = arith.cmpi eq, %arg1, %c1_i32 : i32
    %143 = arith.extui %142 : i1 to i32
    %c0_i32_61 = arith.constant 0 : i32
    %144 = arith.cmpi ne, %143, %c0_i32_61 : i32
    scf.if %144 {
      %c0_62 = arith.constant 0 : index
      %c0_63 = arith.constant 0 : index
      %c0_64 = arith.constant 0 : index
      %145 = vector.load %arg16[%c0_62, %c0_63, %c0_64] : memref<1x8x32xf32, #tpu.memory_space<vmem>>, vector<1x8x32xf32>
      %146 = vector.shape_cast %145 : vector<1x8x32xf32> to vector<8x32xf32>
      %147 = vector.shape_cast %140 : vector<8x32xf32> to vector<1x8x32xf32>
      tpu.vector_store %arg16[%c0_62, %c0_63, %c0_64], %147 {strides = array<i32>} : memref<1x8x32xf32, #tpu.memory_space<vmem>>, vector<1x8x32xf32>,
    } else {
    }
    return
  }
  func.func @transform_0(%arg0: i32, %arg1: i32) -> (i32, i32, i32) {
    %c0_i32 = arith.constant 0 : i32
    %c0_i32_0 = arith.constant 0 : i32
    %c0_i32_1 = arith.constant 0 : i32
    return %arg0, %c0_i32, %c0_i32_0 : i32, i32, i32
  }
  func.func @transform_1(%arg0: i32, %arg1: i32) -> (i32, i32) {
    %c0_i32 = arith.constant 0 : i32
    %c0_i32_0 = arith.constant 0 : i32
    %c0_i32_1 = arith.constant 0 : i32
    return %c0_i32, %c0_i32_0 : i32, i32
  }
  func.func @transform_2(%arg0: i32, %arg1: i32) -> (i32, i32, i32) {
    %c0_i32 = arith.constant 0 : i32
    %c0_i32_0 = arith.constant 0 : i32
    %c0_i32_1 = arith.constant 0 : i32
    return %arg1, %c0_i32, %c0_i32_0 : i32, i32, i32
  }
  func.func @transform_3(%arg0: i32, %arg1: i32) -> (i32, i32, i32) {
    %c0_i32 = arith.constant 0 : i32
    %c0_i32_0 = arith.constant 0 : i32
    %c0_i32_1 = arith.constant 0 : i32
    return %arg1, %c0_i32, %c0_i32_0 : i32, i32, i32
  }
  func.func @transform_4(%arg0: i32, %arg1: i32) -> (i32, i32, i32, i32) {
    %c0_i32 = arith.constant 0 : i32
    %c0_i32_0 = arith.constant 0 : i32
    %c0_i32_1 = arith.constant 0 : i32
    %c0_i32_2 = arith.constant 0 : i32
    return %arg1, %c0_i32, %c0_i32_0, %c0_i32_1 : i32, i32, i32, i32
  }
  func.func @transform_5(%arg0: i32, %arg1: i32) -> (i32, i32, i32) {
    %c0_i32 = arith.constant 0 : i32
    %c0_i32_0 = arith.constant 0 : i32
    %c0_i32_1 = arith.constant 0 : i32
    return %arg1, %c0_i32, %c0_i32_0 : i32, i32, i32
  }
  func.func @transform_6(%arg0: i32, %arg1: i32) -> (i32, i32, i32) {
    %c0_i32 = arith.constant 0 : i32
    %c0_i32_0 = arith.constant 0 : i32
    %c0_i32_1 = arith.constant 0 : i32
    return %arg1, %c0_i32, %c0_i32_0 : i32, i32, i32
  }
  func.func @transform_7(%arg0: i32, %arg1: i32) -> (i32, i32, i32) {
    %c0_i32 = arith.constant 0 : i32
    %c0_i32_0 = arith.constant 0 : i32
    %c0_i32_1 = arith.constant 0 : i32
    return %arg1, %c0_i32, %c0_i32_0 : i32, i32, i32
  }
  func.func @transform_8(%arg0: i32, %arg1: i32) -> (i32, i32, i32) {
    %c0_i32 = arith.constant 0 : i32
    %c0_i32_0 = arith.constant 0 : i32
    %c0_i32_1 = arith.constant 0 : i32
    return %arg1, %c0_i32, %c0_i32_0 : i32, i32, i32
  }
  func.func @transform_9(%arg0: i32, %arg1: i32) -> (i32, i32, i32) {
    %c0_i32 = arith.constant 0 : i32
    %c0_i32_0 = arith.constant 0 : i32
    %c0_i32_1 = arith.constant 0 : i32
    return %arg1, %c0_i32, %c0_i32_0 : i32, i32, i32
  }
  func.func @transform_10(%arg0: i32, %arg1: i32) -> (i32, i32, i32) {
    %c0_i32 = arith.constant 0 : i32
    %c0_i32_0 = arith.constant 0 : i32
    %c0_i32_1 = arith.constant 0 : i32
    return %arg1, %c0_i32, %c0_i32_0 : i32, i32, i32
  }
  func.func @transform_11(%arg0: i32, %arg1: i32) -> (i32, i32, i32) {
    %c0_i32 = arith.constant 0 : i32
    %c0_i32_0 = arith.constant 0 : i32
    %c0_i32_1 = arith.constant 0 : i32
    return %arg1, %c0_i32, %c0_i32_0 : i32, i32, i32
  }
  func.func @transform_12(%arg0: i32, %arg1: i32) -> (i32, i32, i32) {
    %c0_i32 = arith.constant 0 : i32
    %c0_i32_0 = arith.constant 0 : i32
    %c0_i32_1 = arith.constant 0 : i32
    return %arg1, %c0_i32, %c0_i32_0 : i32, i32, i32
  }
  func.func @transform_13(%arg0: i32, %arg1: i32) -> (i32, i32, i32) {
    %c0_i32 = arith.constant 0 : i32
    %c0_i32_0 = arith.constant 0 : i32
    %c0_i32_1 = arith.constant 0 : i32
    return %arg1, %c0_i32, %c0_i32_0 : i32, i32, i32
  }
  func.func @transform_14(%arg0: i32, %arg1: i32) -> (i32, i32, i32) {
    %c0_i32 = arith.constant 0 : i32
    %c0_i32_0 = arith.constant 0 : i32
    %c0_i32_1 = arith.constant 0 : i32
    return %arg0, %c0_i32, %c0_i32_0 : i32, i32, i32
  }
}

</mosaic_0001>

<bundles_post_ra>
// kernel: tpu_custom_call.1
= control target key start
LH: loop header
LB: loop body
LE: loop exit
PB: predicated region body
PF: predicated region fallthrough
CT: control target
= control target key end

     0   :  { %s2916_s0 = inlined_call_operand.hbm [shape: f32[2,8,32], index: 0, kind: input, shape index: {}]   ;;  %s2917_s1 = inlined_call_operand.hbm [shape: f32[8,32], index: 1, kind: input, shape index: {}]   ;;  %s2918_s2 = inlined_call_operand.vmem [shape: bf16[2,32,96], index: 2, kind: input, shape index: {}]   ;;  %s2919_s3 = inlined_call_operand.vmem [shape: f32[2,1,96], index: 3, kind: input, shape index: {}]   ;;  %s2920_s4 = inlined_call_operand.vmem [shape: bf16[2,4,8,32], index: 4, kind: input, shape index: {}]   ;;  %s2921_s5 = inlined_call_operand.vmem [shape: f32[2,1,32], index: 5, kind: input, shape index: {}]   ;;  %s2922_s6 = inlined_call_operand.vmem [shape: bf16[2,32,64], index: 6, kind: input, shape index: {}]   ;;  %s2923_s7 = inlined_call_operand.vmem [shape: f32[2,1,64], index: 7, kind: input, shape index: {}]   ;;  %s2924_s8 = inlined_call_operand.vmem [shape: bf16[2,64,32], index: 8, kind: input, shape index: {}]   ;;  %s2925_s9 = inlined_call_operand.vmem [shape: f32[2,1,32], index: 9, kind: input, shape index: {}]   ;;  %s2926_s10 = inlined_call_operand.vmem [shape: f32[2,1,32], index: 10, kind: input, shape index: {}]   ;;  %s2927_s11 = inlined_call_operand.vmem [shape: f32[2,1,32], index: 11, kind: input, shape index: {}]   ;;  %s2928_s12 = inlined_call_operand.vmem [shape: f32[2,1,32], index: 12, kind: input, shape index: {}]   ;;  %s2929_s13 = inlined_call_operand.vmem [shape: f32[2,1,32], index: 13, kind: input, shape index: {}]   ;;  %s2930_s14 = inlined_call_operand.hbm [shape: f32[2,8,32], index: 14, kind: output, shape index: {}]  }
   0x1   :  { %2948 = sst [smem:[#allocation25_spill]] %s2916_s0 }
   0x2   :  { %2949 = sst [smem:[#allocation26_spill]] %s2917_s1 }
   0x3   :  { %2950 = sst [smem:[#allocation27_spill]] %s2918_s2 }
   0x4   :  { %2951 = sst [smem:[#allocation28_spill]] %s2920_s4 }
   0x5   :  { %2952 = sst [smem:[#allocation29_spill]] %s2922_s6 }
   0x6   :  { %2953 = sst [smem:[#allocation30_spill]] %s2923_s7 }
   0x7   :  { %2954 = sst [smem:[#allocation31_spill]] %s2924_s8 }
   0x8   :  { %2955 = sst [smem:[#allocation32_spill]] %s2926_s10 }
   0x9   :  { %2956 = sst [smem:[#allocation33_spill]] %s2927_s11 }
   0xa   :  { %2957 = sst [smem:[#allocation34_spill]] %s2928_s12 }
   0xb   :  { %2958 = sst [smem:[#allocation35_spill]] %s2929_s13 }
   0xc   :  { %2959 = sst [smem:[#allocation36_spill]] %s2930_s14 }
   0xd   :  { %19 = vsyncpa [#allocation4], 0 }
   0xe   :  { %21 = vsyncpa [#allocation4 + $0x1], 0 }
   0xf   :  { %22 = vsyncpa [#allocation7], 0 }
  0x10   :  { %23 = vsyncpa [#allocation5], 0 }
  0x11   :  { %25 = vsyncpa [#allocation5 + $0x1], 0  ;;  %s2463_s29 = smov 0   ;;  %s2465_s30 = smov 0  }
  0x12   :  { %s2467_s15 = smov 0   ;;  %s2469_s16 = smov 0  }
  0x13   :  { %s2471_s17 = smov 0   ;;  %s2473_s18 = smov 0  }
  0x14   :  { %s2475_s19 = smov 0   ;;  %s2477_s20 = smov 0  }
  0x15 LB: > { %2960 = sst [smem:[#allocation12_spill]] %s2348_s29  ;;  %s1897_s21 = sadd.s32 4294967295, %s2376_s20   ;;  %s2376_s20 = sphi %s2477_s20, %s31_s20   ;;  %s2372_s19 = sphi %s2475_s19, %s3018_s19   ;;  %s2368_s18 = sphi %s2473_s18, %s3017_s18   ;;  %s2364_s17 = sphi %s2471_s17, %s3016_s17   ;;  %s2360_s16 = sphi %s2469_s16, %s3015_s16   ;;  %s2356_s15 = sphi %s2467_s15, %s3014_s15   ;;  %s2352_s30 = sphi %s2465_s30, %s3013_s30   ;;  %s2348_s29 = sphi %s2463_s29, %s3012_s29  }
  0x16   : > { %2961 = sst [smem:[#allocation13_spill]] %s2352_s30  ;;  %s1898_s22 = sadd.s32 4294967294, %s2376_s20  }
  0x17   : > { %2962 = sst [smem:[#allocation14_spill]] %s2356_s15  ;;  %p63_p0 = scmp.ne.s32.totalorder %s2352_s30, %s2348_s29 }
  0x18   : > { %2963 = sst [smem:[#allocation15_spill]] %s2364_s17  ;;  %p2507_p1 = scmp.eq.s32.totalorder %s1897_s21, 0 }
  0x19   : > { %2964 = sst [smem:[#allocation16_spill]] %s2368_s18  ;;  %p2511_p2 = scmp.eq.s32.totalorder %s1897_s21, 3 }
  0x1a   : > { %2965 = sst [smem:[#allocation17_spill]] %s2372_s19  ;;  %p426_p3 = scmp.eq.s32.totalorder %s1898_s22, 3 }
  0x1b   : > { %2966 = sst [smem:[#allocation18_spill]] %s2376_s20  ;;  %p2517_p4 = por %p2507_p1, %p63_p0 }
  0x1c   : > { %s2967_s23 = scalar_select %p2507_p1, 1, 0 }
  0x1d   : > { %s2968_s24 = scalar_select %p2511_p2, 1, 0 }
  0x1e   : > { %s2969_s25 = scalar_select %p2517_p4, 1, 0 }
  0x1f   : > { %p1899_p5 = scmp.ge.s32.totalorder %s2376_s20, 1  ;;  %p2522_p6 = por %p426_p3, %p63_p0 }
  0x20   : > { %p433_p7 = scmp.lt.s32.totalorder %s2376_s20, 5  ;;  %s2378_s28 = smov [#allocation6]  }
  0x21   : > { %s2970_s26 = scalar_select %p2522_p6, 1, 0 }
  0x22   : > { %p2527_p8 = pnand %p1899_p5, %p433_p7  ;;  %s446_s21 = sshll.u32 %s2378_s28, 4  ;;  %s447_s21 = int_to_ptr.vmem [resolvable:$true] %s446_s21 }
  0x23   : > { %2971 = sst [smem:[#allocation19_spill]] %s2970_s26  ;;  %s40_s29 = sadd.s32 1, %s2368_s18 }
  0x24   : > { %s2972_s27 = scalar_select %p2527_p8, 1, 0 }
  0x25   : > { %p2100_p9 = pneg %p2527_p8  ;;  %s2974_s1 = sld [smem:[#allocation26_spill]] }
  0x27   : > { %p2535_p10 = pnand %p2100_p9, %p2507_p1 }
  0x29   : > { %p2218_p12 = pneg %p2535_p10 }
  0x2b   : > { %s2216_s17 = scalar_lea.hbm %s2974_s1, 128 }
  0x2c   : > { %p2217_p11 = scmp.ne.s32.totalorder %s2974_s1, %s2216_s17  ;;  %p2223_p3 = scmp.lt.u32.totalorder %s2216_s17, %s2974_s1 }
  0x2e   : > { %p2219_p13 = pnand %p2218_p12, %p2217_p11 }
  0x30   : > { %p2220_p0 = pneg %p2219_p13 }
  0x32   : > { %p2225_p5 = pnand %p2223_p3, %p2220_p0 }
  0x34   : > { %2228 = shalt.err (!%p2225_p5)
}
  0x35   : > { %s2229_s10 = scalar_lea.vmem %s447_s21, 128  ;;  %p2237_p1 = scmp.lt.s32.totalorder %s447_s21, %s447_s21 }
  0x36   : > { %p2230_p7 = scmp.ne.s32.totalorder %s447_s21, %s2229_s10  ;;  %p2238_p4 = scmp.lt.s32.totalorder %s2229_s10, %s2229_s10 }
  0x38   : > { %p2232_p9 = pnand %p2230_p7, %p2218_p12  ;;  %p2239_p8 = por %p2238_p4, %p2237_p1 }
  0x3a   : > { %p2233_p6 = pneg %p2232_p9 }
  0x3c   : > { %p2240_p2 = pnand %p2239_p8, %p2233_p6 }
  0x3e   : > { %2243 = shalt.err (!%p2240_p2)
}
  0x3f   : > { %2103 = dma.hbm_to_vmem [thread:$0]  (!%p2535_p10), %s2974_s1, 128, %s447_s21, [#allocation7]  }
  0x40   : > { %p41_p11 = scmp.ge.s32.totalorder %s40_s29, 2  ;;  %s43_s10 = sadd.s32 1, %s2372_s19 }
  0x41   : > { %s50_s11 = sadd.s32 1, %s2356_s15  ;;  %p57_p1 = scmp.ne.s32.totalorder %s2356_s15, %s2352_s30 }
  0x42   : > { %s3020_s29 = smov (%p41_p11, %s40_s29), 0  ;;  %s3022_s10 = smov (!%p41_p11, %s43_s10), %s2372_s19 }
  0x43   : > { %2975 = sst [smem:[#allocation20_spill]] %s3020_s29  ;;  %p58_p2 = scmp.eq.s32.totalorder %s2376_s20, 0 }
  0x44   : > { %p2976_p4 = scmp.ne.s32.totalorder %s2968_s24, 0  ;;  %p45_p8 = scmp.ge.s32.totalorder %s3022_s10, 2 }
  0x45   : > { %p2113_p12 = scmp.lt.s32.totalorder %s2376_s20, 4  ;;  %p59_p13 = por %p58_p2, %p57_p1 }
  0x46   : > { %p2566_p6 = por %p2976_p4, %p57_p1  ;;  %s457_s17 = sand.u32 1, %s2356_s15  }
  0x47   : > { %s3024_s10 = smov (%p45_p8, %s3022_s10), 0  ;;  %s1902_s26 = sshll.u32 %s457_s17, 3 }
  0x48   : > { %s2977_s14 = scalar_select %p2566_p6, 1, 0 }
  0x49   : > { %2979 = sst [smem:[#allocation22_spill]] %s3024_s10  ;;  %s47_s21 = ssub.s32 %s2372_s19, %s3024_s10 }
  0x4a   : > { %2978 = sst [smem:[#allocation21_spill]] %s2977_s14  ;;  %p48_p10 = scmp.eq.s32.totalorder %s47_s21, 0 }
  0x4b   : > { %s1903_s22 = sshll.u32 %s2372_s19, 7  ;;  %s2980_s0 = sld [smem:[#allocation25_spill]] }
  0x4c   : > { %s461_s13 = scalar_lea.vmem [#allocation3], %s1902_s26  ;;  %p2589_p0 = pnand %p2113_p12, %p59_p13 }
  0x4d   : > { %s468_s1 = sshll.u32 %s461_s13, 4  ;;  %s458_s21 = scalar_lea.sflag [#allocation4], %s457_s17  ;;  %s2585_s1 = int_to_ptr.vmem [resolvable:$true] %s468_s1 }
  0x4e   : > { %s2583_s29 = scalar_select %p48_p10, %s2356_s15, %s50_s11  }
  0x4f   : > { %p2246_p5 = pneg %p2589_p0 }
  0x50   : > { %2981 = sst [smem:[#allocation23_spill]] %s2583_s29 }
  0x51   : > { %s2580_s24 = scalar_lea.hbm %s2980_s0, %s1903_s22  ;;  %s2249_s28 = scalar_lea.hbm %s2980_s0, 256 }
  0x52   : > { %s2244_s22 = scalar_lea.hbm %s2580_s24, 128  ;;  %p2250_p11 = scmp.lt.u32.totalorder %s2580_s24, %s2980_s0 }
  0x53   : > { %p2245_p3 = scmp.ne.s32.totalorder %s2580_s24, %s2244_s22  ;;  %p2251_p1 = scmp.lt.u32.totalorder %s2249_s28, %s2244_s22 }
  0x54   : > { %p2253_p4 = scmp.lt.u32.totalorder %s2244_s22, %s2580_s24 }
  0x55   : > { %p2247_p7 = pnand %p2246_p5, %p2245_p3  ;;  %p2252_p2 = por %p2251_p1, %p2250_p11 }
  0x57   : > { %p2248_p9 = pneg %p2247_p7  ;;  %p2254_p8 = por %p2253_p4, %p2252_p2 }
  0x59   : > { %p2255_p12 = pnand %p2254_p8, %p2248_p9 }
  0x5b   : > { %2258 = shalt.err (!%p2255_p12)
}
  0x5c   : > { %s2259_s17 = scalar_lea.vmem %s2585_s1, 128  ;;  %s2379_s11 = smov [#allocation3]  }
  0x5d   : > { %p2260_p13 = scmp.ne.s32.totalorder %s2585_s1, %s2259_s17  ;;  %s2264_s26 = sshll.u32 %s2379_s11, 4  ;;  %s2265_s26 = int_to_ptr.vmem [resolvable:$false] %s2264_s26 }
  0x5e   : > { %s2266_s12 = scalar_lea.vmem %s2265_s26, 256  ;;  %p2267_p7 = scmp.lt.s32.totalorder %s2585_s1, %s2265_s26 }
  0x5f   : > { %p2262_p10 = pnand %p2260_p13, %p2246_p5  ;;  %p2268_p11 = scmp.lt.s32.totalorder %s2266_s12, %s2259_s17 }
  0x61   : > { %p2263_p3 = pneg %p2262_p10  ;;  %p2269_p1 = por %p2268_p11, %p2267_p7 }
  0x63   : > { %p2270_p2 = pnand %p2269_p1, %p2263_p3 }
  0x65   : > { %2273 = shalt.err (!%p2270_p2)
}
  0x66   : > { %2107 = dma.hbm_to_vmem [thread:$0]  (!%p2589_p0), %s2580_s24, 128, %s2585_s1, %s458_s21  }
  0x67   : > { %p2983_p9 = scmp.ne.s32.totalorder %s2972_s27, 0 }
  0x69   : > { %557 = sbr.rel (%p2983_p9) target bundleno = 2658 (0xa62), region = 76 }
  0x70   : > { %s2621_s22 = sand.u32 1, %s2352_s30   ;;  %p2985_p5 = scmp.ne.s32.totalorder %s2969_s25, 0 }
  0x71   : > { %2984 = sst [smem:[#allocation24_spill]] %s2621_s22  ;;  %s1905_s28 = sshll.u32 %s2621_s22, 3 }
  0x72   : > { %s560_s13 = scalar_lea.sflag [#allocation4], %s2621_s22  ;;  %s563_s17 = scalar_lea.vmem [#allocation3], %s1905_s28 }
  0x73   : > { %2335 = dma.done.wait (%p2985_p5), %s560_s13, 128  }
  0x74   : > { %2337 = vsyncadd (%p2985_p5), %s560_s13, 4294967168  ;;  %p2986_p4 = scmp.ne.s32.totalorder %s2967_s23, 0 }
  0x76   : > { %2339 = dma.done.wait (%p2986_p4), [#allocation7], 128  }
  0x77   : > { %2341 = vsyncadd (%p2986_p4), [#allocation7], 4294967168  ;;  %p656_p0 = scmp.lt.s32.totalorder %s2360_s16, 1  ;;  %s2987_s2 = sld [smem:[#allocation27_spill]] }
  0x78   : > { %s2988_s4 = sld [smem:[#allocation28_spill]]  ;;  %s2989_s6 = sld [smem:[#allocation29_spill]] }
  0x79   : > { %s2635_s1 = scalar_select %p656_p0, %s2360_s16, 1 }
  0x7a   : > { %s2991_s8 = sld [smem:[#allocation31_spill]]  ;;  %s2992_s20 = sld [smem:[#allocation32_spill]] }
  0x7b   : > { %s1953_s25 = sshll.u32 %s2635_s1, 4  ;;  %s1956_s24 = sshll.u32 %s2635_s1, 5 }
  0x7c   : > { %s687_s0 = scalar_lea.vmem %s2925_s9, %s2635_s1  ;;  %s2994_s23 = sld [smem:[#allocation34_spill]] }
  0x7d   : > { %s660_s11 = scalar_lea.vmem %s2987_s2, %s1953_s25  ;;  %p1916_p8 = scmp.ne.s32.totalorder %s2360_s16, 0 }
  0x7e   : > { %s2648_s13 = scalar_lea.vmem %s2988_s4, %s1953_s25  ;;  %s2657_s30 = scalar_lea.vmem %s2989_s6, %s1953_s25  ;;  %v705_v0 = vld [vmem:[%s563_s17] sm:$0xff] (!%p1916_p8)  ;;  %v706_v1 = vld [vmem:[#allocation6] sm:$0xff] (!%p1916_p8)  ;;  %vm708_vm0 = vcmask (!%p1916_p8), 261120  }
  0x7f   : > { %s2993_s6 = sld [smem:[#allocation33_spill]]  ;;  %v707_v2 = vadd.f32 (!%p1916_p8), %v706_v1, %v705_v0 }
  0x80   : > { %s2667_s26 = scalar_lea.vmem %s2991_s8, %s1956_s24  ;;  %s690_s29 = scalar_lea.vmem %s2992_s20, %s2635_s1 }
  0x81   : > { %s2995_s24 = sld [smem:[#allocation35_spill]]  ;;  %s2689_s8 = scalar_lea.vmem [#allocation8], %s1905_s28  ;;  %709 = vst.msk [vmem:[#allocation2] sm:$0xff] (!%p1916_p8), %vm708_vm0, %v707_v2 }
  0x82   : > { %s696_s22 = scalar_lea.vmem %s2994_s23, %s2635_s1  ;;  %704 = sbr.rel (%p1916_p8) target bundleno = 137 (0x89), region = 88 }
  0x85   : > { %s693_s14 = scalar_lea.vmem %s2993_s6, %s2635_s1 }
  0x87   : > { %s699_s21 = scalar_lea.vmem %s2995_s24, %s2635_s1 }
  0x89 PF: > { %v2188_v3 = vld [vmem:[%s660_s11] sm:$0xff]   ;;  %v2380_v4 = vmov 0.0   ;;  %v2189_v5 = vld [vmem:[%s660_s11 + $0x8] sm:$0xff]   ;;  %vm2381_vm1 = vmmov 0   ;;  %vm735_vm2 = vcmask 261120   ;;  %s2996_s7 = scalar_lea.vmem %s2919_s3, %s2635_s1  ;;  %s2382_s18 = smov 104  }
  0x8a   : > { %1992 = vmatprep.subr.bf16.mxu1 %v2380_v4  ;;  %2006 = vmatprep.subr.bf16.mxu0 %v2380_v4  ;;  %v2696_v6 = vld [vmem:[#allocation2] sm:$0xff]  ;;  %s2383_s20 = smov 120   ;;  %s2384_s28 = smov 112   ;;  %vm811_vm3 = vcmask 64512   ;;  %vm1058_vm4 = vcmask 1043456   ;;  %vm1592_vm5 = vcmask 523264  }
  0x8b   : > { %1993 = vmatpush3.bf16.msra.mxu1 %v2188_v3  ;;  %1996 = vmatprep.mubr.msk.bf16.mxu1 %vm2381_vm1, %v2380_v4  ;;  %v711_v7 = vpack.c.bf16 %v2696_v6, %v2696_v6  ;;  %v1917_v8 = vld [vmem:[%s2996_s7] ss:$0 sm:$0xff]  ;;  %s2385_s17 = smov 96   ;;  %s2386_s23 = smov 64  }
  0x8c   : > { %1994 = vmatprep.subr.bf16.mxu1 %v2380_v4  ;;  %2008 = vmatprep.mubr.msk.bf16.mxu0 %vm2381_vm1, %v2380_v4  ;;  %s2997_s12 = scalar_lea.vmem %s2921_s5, %s2635_s1  ;;  %s3000_s24 = sld [smem:[#allocation30_spill]] }
  0x8d   : > { %p1948_p12 = scmp.ne.s32.totalorder %s2360_s16, 1 }
  0x8f   : > { %1995 = vmatpush3.bf16.msra.mxu1 %v2189_v5 }
  0x90   : > { %2000 = vmatprep.subr.bf16.mxu1 %v2380_v4 }
  0x92   : > { %1997 = vmatmul.mubr.msk.bf16.vlgmr.msra.gmra.mrb[0].mxu1 %vm735_vm2, %v711_v7  ;;  %s3001_s4 = scalar_lea.vmem %s3000_s24, %s2635_s1 }
  0x93   : > { %2002 = vmatprep.mubr.msk.bf16.mxu1 %vm2381_vm1, %v2380_v4 }
 0x165   : > { %v773_v9 = vpop.f32.mrb[0].mxu1 }
 0x166   : > { %v774_v10 = vadd.f32 %v1917_v8, %v773_v9  ;;  %v1998_v11 = vpop.f32.mrb[1].mxu1 }
 0x167   : > { %v776_v12 = vpop.f32.mrb[2].mxu1 }
 0x168   : > { %801 = vrot.lane.b32.xlu1 %v774_v10, %s2382_s18  ;;  %795 = vrot.lane.b32.xlu0 %v774_v10, %s2383_s20  ;;  %v1999_v13 = vpop.f32.mrb[3].mxu1  ;;  %v2712_v14 = vpack.c.bf16 %v774_v10, %v774_v10  ;;  %v779_v15 = vmul.f32 0.35355338, %v774_v10 }
 0x16a   : > { %v790_v24 = vpack.c.bf16 %v779_v15, %v779_v15 }
 0x16c   : > { %798 = vrot.lane.b32.xlu0 %v774_v10, %s2384_s28  ;;  %809 = vrot.lane.b32.xlu1 %v2712_v14, %s2385_s17 }
 0x170   : > { %781 = vrot.lane.b32.xlu1 %v779_v15, %s2383_s20 }
 0x1da   : > { %v802_v16 = vpop.permute.xlu1 %801  ;;  %v796_v17 = vpop.permute.xlu0 %795 }
 0x1db   : > { %v2715_v18 = vpack.c.bf16 %v802_v16, %v802_v16  ;;  %v2717_v19 = vpack.c.bf16 %v796_v17, %v796_v17 }
 0x1dd   : > { %859 = vrot.lane.b32.xlu0 %v2717_v19, %s2385_s17  ;;  %957 = vrot.lane.b32.xlu1 %v2715_v18, %s2385_s17 }
 0x1de   : > { %v799_v20 = vpop.permute.xlu0 %798  ;;  %v810_v21 = vpop.permute.xlu1 %809 }
 0x1df   : > { %v2721_v22 = vpack.c.bf16 %v799_v20, %v799_v20  ;;  %v816_v23 = vsel %vm811_vm3, %v810_v21, 0 }
 0x1e0   : > { %2001 = vmatpush3.bf16.xpose.msra.mxu1 %v816_v23 }
 0x1e1   : > { %908 = vrot.lane.b32.xlu0 %v2721_v22, %s2385_s17  ;;  %787 = vrot.lane.b32.xlu1 %v779_v15, %s2382_s18 }
 0x1e2   : > { %2012 = vmatprep.subr.bf16.mxu1 %v2380_v4  ;;  %v782_v27 = vpop.permute.xlu1 %781 }
 0x1e3   : > { %v791_v31 = vpack.c.bf16 %v782_v27, %v782_v27 }
 0x1e5   : > { %784 = vrot.lane.b32.xlu0 %v779_v15, %s2384_s28 }
 0x1e7   : > { %2003 = vmatmul.mubr.msk.bf16.vlgmr.msra.gmra.mrb[4].mxu1 %vm811_vm3, %v790_v24 }
 0x1e8   : > { %2014 = vmatprep.mubr.msk.bf16.mxu1 %vm2381_vm1, %v2380_v4 }
 0x24f   : > { %v860_v25 = vpop.permute.xlu0 %859  ;;  %v958_v30 = vpop.permute.xlu1 %957 }
 0x250   : > { %v865_v26 = vsel %vm811_vm3, %v860_v25, 0  ;;  %v963_v33 = vsel %vm811_vm3, %v958_v30, 0 }
 0x251   : > { %2007 = vmatpush3.bf16.xpose.msra.mxu0 %v865_v26 }
 0x252   : > { %2018 = vmatprep.subr.bf16.mxu0 %v2380_v4 }
 0x253   : > { %v909_v28 = vpop.permute.xlu0 %908  ;;  %v788_v35 = vpop.permute.xlu1 %787 }
 0x254   : > { %v914_v29 = vsel %vm811_vm3, %v909_v28, 0  ;;  %v793_v36 = vpack.c.bf16 %v788_v35, %v788_v35 }
 0x255   : > { %2013 = vmatpush3.bf16.xpose.msra.mxu1 %v914_v29 }
 0x256   : > { %2024 = vmatprep.subr.bf16.mxu1 %v2380_v4 }
 0x257   : > { %v785_v32 = vpop.permute.xlu0 %784 }
 0x258   : > { %2009 = vmatmul.mubr.msk.bf16.vlgmr.msra.gmra.mrb[0].mxu0 %vm811_vm3, %v791_v31  ;;  %v792_v34 = vpack.c.bf16 %v785_v32, %v785_v32 }
 0x259   : > { %2019 = vmatpush3.bf16.xpose.msra.mxu0 %v963_v33  ;;  %2020 = vmatprep.mubr.msk.bf16.mxu0 %vm2381_vm1, %v2380_v4  ;;  %v1250_v33 = vld [vmem:[%s2648_s13] sm:$0xf] }
 0x25a   : > { %2030 = vmatprep.subr.bf16.mxu0 %v2380_v4 }
 0x25c   : > { %2015 = vmatmul.mubr.msk.bf16.vlgmr.msra.gmra.mrb[8].mxu1 %vm811_vm3, %v792_v34 }
 0x25d   : > { %2026 = vmatprep.mubr.msk.bf16.mxu1 %vm2381_vm1, %v2380_v4 }
 0x260   : > { %2021 = vmatmul.mubr.msk.bf16.vlgmr.msra.gmra.mrb[4].mxu0 %vm811_vm3, %v793_v36 }
 0x261   : > { %2032 = vmatprep.mubr.msk.bf16.mxu0 %vm2381_vm1, %v2380_v4 }
 0x2ba   : > { %v852_v37 = vpop.f32.mrb[4].mxu1 }
 0x2bb   : > { %v2004_v38 = vpop.f32.mrb[5].mxu1  ;;  %v1005_v39 = vsel %vm811_vm3, %v852_v37, -inf }
 0x2bc   : > { %1006 = vmax.xlane.f32.xlu0 %v1005_v39  ;;  %v855_v40 = vpop.f32.mrb[6].mxu1 }
 0x2bd   : > { %v2005_v41 = vpop.f32.mrb[7].mxu1 }
 0x2be   : > { %v1251_v41 = vld [vmem:[%s2648_s13 + $0x4] sm:$0xf] }
 0x32b   : > { %v901_v42 = vpop.f32.mrb[0].mxu0 }
 0x32c   : > { %v2010_v43 = vpop.f32.mrb[1].mxu0  ;;  %v1008_v44 = vsel %vm811_vm3, %v901_v42, -inf }
 0x32d   : > { %1009 = vmax.xlane.f32.xlu1 %v1008_v44  ;;  %v904_v45 = vpop.f32.mrb[2].mxu0  ;;  %v1252_v43 = vld [vmem:[%s2648_s13 + $0x8] sm:$0xf] }
 0x32e   : > { %v2011_v46 = vpop.f32.mrb[3].mxu0 }
 0x32f   : > { %v950_v47 = vpop.f32.mrb[8].mxu1 }
 0x330   : > { %v2016_v48 = vpop.f32.mrb[9].mxu1  ;;  %v1011_v49 = vsel %vm811_vm3, %v950_v47, -inf }
 0x331   : > { %1012 = vmax.xlane.f32.xlu0 %v1011_v49  ;;  %v953_v50 = vpop.f32.mrb[10].mxu1 }
 0x332   : > { %v2017_v51 = vpop.f32.mrb[11].mxu1  ;;  %v1253_v50 = vld [vmem:[%s2648_s13 + $0xc] sm:$0xf] }
 0x333   : > { %v999_v52 = vpop.f32.mrb[4].mxu0 }
 0x334   : > { %v2022_v53 = vpop.f32.mrb[5].mxu0  ;;  %v1014_v54 = vsel %vm811_vm3, %v999_v52, -inf }
 0x335   : > { %v1002_v55 = vpop.f32.mrb[6].mxu0  ;;  %1015 = vmax.xlane.f32.xlu0 %v1014_v54  ;;  %v1396_v54 = vsel %vm1058_vm4, %v1253_v50, 0  ;;  %v2194_v50 = vld [vmem:[%s2667_s26 + $0x10] sm:$0xff]  }
 0x336   : > { %v2023_v56 = vpop.f32.mrb[7].mxu0 }
 0x33e   : > { %1053 = vrot.lane.b32.xlu1 %v2712_v14, %s2386_s23 }
 0x349   : > { %v1007_v57 = vpop.xlane.xlu0 %1006 }
 0x34a   : > { %v1017_v58 = vsub.f32 %v852_v37, %v1007_v57  ;;  %v1258_v37 = vsel %vm1058_vm4, %v1250_v33, 0 }
 0x34c   : > { %v1021_v59 = vmul.f32 1.442695, %v1017_v58 }
 0x34e   : > { %2196 = vpow2.f32 %v1021_v59 }
 0x358   : > { %v2197_v60 = vpop.eup %2196 }
 0x359   : > { %v1029_v61 = vsel %vm811_vm3, %v2197_v60, 0.0 }
 0x362   : > { %1030 = vadd.xlane.f32.xlu1 %v1029_v61 }
 0x3ba   : > { %v1010_v62 = vpop.xlane.xlu1 %1009 }
 0x3bb   : > { %v1018_v63 = vsub.f32 %v901_v42, %v1010_v62  ;;  %v1304_v42 = vsel %vm1058_vm4, %v1251_v41, 0 }
 0x3bd   : > { %v1023_v0 = vmul.f32 1.442695, %v1018_v63 }
 0x3be   : > { %v1054_v1 = vpop.permute.xlu1 %1053  ;;  %v1013_v2 = vpop.xlane.xlu0 %1012 }
 0x3bf   : > { %2198 = vpow2.f32 %v1023_v0  ;;  %v1060_v3 = vsel %vm1058_vm4, %v1054_v1, 0  ;;  %v1019_v5 = vsub.f32 %v950_v47, %v1013_v2  ;;  %v1350_v47 = vsel %vm1058_vm4, %v1252_v43, 0 }
 0x3c0   : > { %2025 = vmatpush3.bf16.msra.mxu1 %v1060_v3 }
 0x3c1   : > { %v1025_v7 = vmul.f32 1.442695, %v1019_v5  ;;  %2036 = vmatprep.subr.bf16.mxu1 %v2380_v4 }
 0x3c2   : > { %v1016_v8 = vpop.xlane.xlu0 %1015 }
 0x3c3   : > { %2200 = vpow2.f32 %v1025_v7  ;;  %v1020_v9 = vsub.f32 %v999_v52, %v1016_v8 }
 0x3c5   : > { %v1027_v10 = vmul.f32 1.442695, %v1020_v9 }
 0x3c7   : > { %2202 = vpow2.f32 %v1027_v10 }
 0x3c9   : > { %v2199_v11 = vpop.eup %2198 }
 0x3ca   : > { %v1032_v12 = vsel %vm811_vm3, %v2199_v11, 0.0 }
 0x3cb   : > { %1033 = vadd.xlane.f32.xlu0 %v1032_v12 }
 0x3cd   : > { %v2201_v13 = vpop.eup %2200 }
 0x3ce   : > { %v1035_v14 = vsel %vm811_vm3, %v2201_v13, 0.0 }
 0x3cf   : > { %1036 = vadd.xlane.f32.xlu1 %v1035_v14 }
 0x3d1   : > { %v2203_v15 = vpop.eup %2202 }
 0x3d2   : > { %v1038_v16 = vsel %vm811_vm3, %v2203_v15, 0.0 }
 0x3d3   : > { %1039 = vadd.xlane.f32.xlu0 %v1038_v16 }
 0x3e0   : > { %1150 = vrot.lane.b32.xlu1 %v2721_v22, %s2386_s23 }
 0x3e4   : > { %1198 = vrot.lane.b32.xlu1 %v2715_v18, %s2386_s23 }
 0x3e9   : > { %1102 = vrot.lane.b32.xlu0 %v2717_v19, %s2386_s23 }
 0x3ef   : > { %v1031_v17 = vpop.xlane.xlu1 %1030 }
 0x3f0   : > { %2204 = vrcp.f32 %v1031_v17 }
 0x3fa   : > { %v2205_v20 = vpop.eup %2204 }
 0x3fb   : > { %v1045_v21 = vmul.f32 %v2205_v20, %v2197_v60 }
 0x3fd   : > { %v1049_v23 = vpack.c.bf16 %v1045_v21, %v1045_v21 }
 0x3ff   : > { %2027 = vmatmul.mubr.msk.bf16.vlgmr.msra.gmra.mrb[12].mxu1 %vm811_vm3, %v1049_v23 }
 0x400   : > { %2038 = vmatprep.mubr.msk.bf16.mxu1 %vm2381_vm1, %v2380_v4 }
 0x458   : > { %v1034_v24 = vpop.xlane.xlu0 %1033 }
 0x459   : > { %2206 = vrcp.f32 %v1034_v24 }
 0x45c   : > { %v1037_v25 = vpop.xlane.xlu1 %1036 }
 0x45d   : > { %2208 = vrcp.f32 %v1037_v25 }
 0x460   : > { %v1151_v22 = vpop.permute.xlu1 %1150  ;;  %v1040_v18 = vpop.xlane.xlu0 %1039 }
 0x461   : > { %v1156_v26 = vsel %vm1058_vm4, %v1151_v22, 0  ;;  %2210 = vrcp.f32 %v1040_v18  ;;  %v1933_v18 = vld [vmem:[%s2997_s12] ss:$0 sm:$0xff] }
 0x462   : > { %2037 = vmatpush3.bf16.msra.mxu1 %v1156_v26 }
 0x463   : > { %v2207_v19 = vpop.eup %2206  ;;  %2048 = vmatprep.subr.bf16.mxu1 %v2380_v4 }
 0x464   : > { %v1046_v27 = vmul.f32 %v2207_v19, %v2199_v11  ;;  %v1103_v28 = vpop.permute.xlu0 %1102  ;;  %v1199_v30 = vpop.permute.xlu1 %1198 }
 0x465   : > { %v1108_v29 = vsel %vm1058_vm4, %v1103_v28, 0  ;;  %v1204_v35 = vsel %vm1058_vm4, %v1199_v30, 0 }
 0x466   : > { %2031 = vmatpush3.bf16.msra.mxu0 %v1108_v29  ;;  %v1050_v31 = vpack.c.bf16 %v1046_v27, %v1046_v27 }
 0x467   : > { %v2209_v32 = vpop.eup %2208  ;;  %2042 = vmatprep.subr.bf16.mxu0 %v2380_v4 }
 0x468   : > { %v1047_v34 = vmul.f32 %v2209_v32, %v2201_v13 }
 0x469   : > { %2033 = vmatmul.mubr.msk.bf16.vlgmr.msra.gmra.mrb[8].mxu0 %vm811_vm3, %v1050_v31 }
 0x46a   : > { %2043 = vmatpush3.bf16.msra.mxu0 %v1204_v35  ;;  %v1051_v36 = vpack.c.bf16 %v1047_v34, %v1047_v34  ;;  %2044 = vmatprep.mubr.msk.bf16.mxu0 %vm2381_vm1, %v2380_v4 }
 0x46b   : > { %v2211_v38 = vpop.eup %2210  ;;  %2054 = vmatprep.subr.bf16.mxu0 %v2380_v4 }
 0x46c   : > { %v1048_v39 = vmul.f32 %v2211_v38, %v2203_v15  ;;  %2039 = vmatmul.mubr.msk.bf16.vlgmr.msra.gmra.mrb[16].mxu1 %vm811_vm3, %v1051_v36  ;;  %v2191_v38 = vld [vmem:[%s2657_s30 + $0x8] sm:$0xff]  }
 0x46d   : > { %2049 = vmatpush3.bf16.msra.mxu1 %v1258_v37  ;;  %2050 = vmatprep.mubr.msk.bf16.mxu1 %vm2381_vm1, %v2380_v4  ;;  %v2190_v37 = vld [vmem:[%s2657_s30] sm:$0xff]  }
 0x46e   : > { %v1052_v40 = vpack.c.bf16 %v1048_v39, %v1048_v39  ;;  %2060 = vmatprep.subr.bf16.mxu1 %v2380_v4  ;;  %v2193_v39 = vld [vmem:[%s2667_s26 + $0x8] sm:$0xff]  }
 0x471   : > { %2045 = vmatmul.mubr.msk.bf16.vlgmr.msra.gmra.mrb[12].mxu0 %vm811_vm3, %v1052_v40 }
 0x472   : > { %2056 = vmatprep.mubr.msk.bf16.mxu0 %vm2381_vm1, %v2380_v4  ;;  %2055 = vmatpush3.bf16.msra.mxu0 %v1304_v42 }
 0x473   : > { %2066 = vmatprep.subr.bf16.mxu0 %v2380_v4 }
 0x4d2   : > { %v1096_v44 = vpop.f32.mrb[12].mxu1 }
 0x4d3   : > { %v1246_v45 = vpack.c.bf16 %v1096_v44, %v1096_v44  ;;  %v2028_v46 = vpop.f32.mrb[13].mxu1  ;;  %v1934_v44 = vld [vmem:[%s690_s29] ss:$0 sm:$0xff] }
 0x4d4   : > { %v1099_v48 = vpop.f32.mrb[14].mxu1  ;;  %v1935_v46 = vld [vmem:[%s693_s14] ss:$0 sm:$0xff] }
 0x4d5   : > { %v2029_v49 = vpop.f32.mrb[15].mxu1  ;;  %2051 = vmatmul.mubr.msk.bf16.vlgmr.msra.gmra.mrb[20].mxu1 %vm811_vm3, %v1246_v45 }
 0x4d6   : > { %2061 = vmatpush3.bf16.msra.mxu1 %v1350_v47  ;;  %2062 = vmatprep.mubr.msk.bf16.mxu1 %vm2381_vm1, %v2380_v4 }
 0x4d7   : > { %2072 = vmatprep.subr.bf16.mxu1 %v2380_v4 }
 0x53c   : > { %v1144_v51 = vpop.f32.mrb[8].mxu0 }
 0x53d   : > { %v1247_v52 = vpack.c.bf16 %v1144_v51, %v1144_v51  ;;  %v2034_v53 = vpop.f32.mrb[9].mxu0  ;;  %v2195_v51 = vld [vmem:[%s2667_s26 + $0x18] sm:$0xff]  }
 0x53e   : > { %v1147_v55 = vpop.f32.mrb[10].mxu0 }
 0x53f   : > { %v2035_v56 = vpop.f32.mrb[11].mxu0  ;;  %v1192_v57 = vpop.f32.mrb[16].mxu1  ;;  %2057 = vmatmul.mubr.msk.bf16.vlgmr.msra.gmra.mrb[16].mxu0 %vm811_vm3, %v1247_v52  ;;  %v1936_v52 = vld [vmem:[%s3001_s4] ss:$0 sm:$0xff] }
 0x540   : > { %v1248_v58 = vpack.c.bf16 %v1192_v57, %v1192_v57  ;;  %v2040_v59 = vpop.f32.mrb[17].mxu1  ;;  %2067 = vmatpush3.bf16.msra.mxu0 %v1396_v54  ;;  %2068 = vmatprep.mubr.msk.bf16.mxu0 %vm2381_vm1, %v2380_v4 }
 0x541   : > { %v1195_v60 = vpop.f32.mrb[18].mxu1  ;;  %2080 = vmatprep.subr.bf16.mxu0 %v2380_v4 }
 0x542   : > { %v2041_v61 = vpop.f32.mrb[19].mxu1  ;;  %2063 = vmatmul.mubr.msk.bf16.vlgmr.msra.gmra.mrb[24].mxu1 %vm811_vm3, %v1248_v58 }
 0x543   : > { %2076 = vmatprep.mubr.msk.bf16.mxu1 %vm2381_vm1, %v2380_v4  ;;  %2073 = vmatpush3.bf16.msra.mxu1 %v2190_v37 }
 0x544   : > { %v1240_v62 = vpop.f32.mrb[12].mxu0  ;;  %2074 = vmatprep.subr.bf16.mxu1 %v2380_v4 }
 0x545   : > { %v1249_v63 = vpack.c.bf16 %v1240_v62, %v1240_v62  ;;  %v2046_v0 = vpop.f32.mrb[13].mxu0 }
 0x546   : > { %v1243_v1 = vpop.f32.mrb[14].mxu0 }
 0x547   : > { %v2047_v2 = vpop.f32.mrb[15].mxu0  ;;  %2069 = vmatmul.mubr.msk.bf16.vlgmr.msra.gmra.mrb[20].mxu0 %vm811_vm3, %v1249_v63  ;;  %2075 = vmatpush3.bf16.msra.mxu1 %v2191_v38 }
 0x548   : > { %2088 = vmatprep.mubr.msk.bf16.mxu0 %vm2381_vm1, %v2380_v4 }
 0x5a8   : > { %v1294_v3 = vpop.f32.mrb[20].mxu1 }
 0x5a9   : > { %v2052_v5 = vpop.f32.mrb[21].mxu1  ;;  %v1438_v10 = vsel %vm735_vm2, %v1294_v3, 0.0 }
 0x5aa   : > { %v1297_v7 = vpop.f32.mrb[22].mxu1 }
 0x5ab   : > { %v2053_v8 = vpop.f32.mrb[23].mxu1 }
 0x612   : > { %v1340_v9 = vpop.f32.mrb[16].mxu0 }
 0x613   : > { %v1439_v11 = vsel %vm735_vm2, %v1340_v9, 0.0  ;;  %v2058_v12 = vpop.f32.mrb[17].mxu0 }
 0x614   : > { %v1440_v13 = vadd.f32 %v1439_v11, %v1438_v10  ;;  %v1343_v14 = vpop.f32.mrb[18].mxu0 }
 0x615   : > { %v2059_v15 = vpop.f32.mrb[19].mxu0  ;;  %v1386_v16 = vpop.f32.mrb[24].mxu1  ;;  %v1946_v14 = vld [vmem:[%s696_s22] ss:$0 sm:$0xff] }
 0x616   : > { %v1441_v17 = vsel %vm735_vm2, %v1386_v16, 0.0  ;;  %v2064_v20 = vpop.f32.mrb[25].mxu1  ;;  %v1947_v16 = vld [vmem:[%s699_s21] ss:$0 sm:$0xff] }
 0x617   : > { %v1442_v21 = vadd.f32 %v1441_v17, %v1440_v13  ;;  %v1389_v23 = vpop.f32.mrb[26].mxu1 }
 0x618   : > { %v2065_v24 = vpop.f32.mrb[27].mxu1 }
 0x61a   : > { %v1432_v25 = vpop.f32.mrb[20].mxu0 }
 0x61b   : > { %v1443_v22 = vsel %vm735_vm2, %v1432_v25, 0.0  ;;  %v2070_v26 = vpop.f32.mrb[21].mxu0 }
 0x61c   : > { %v1444_v19 = vadd.f32 %v1443_v22, %v1442_v21  ;;  %v1435_v27 = vpop.f32.mrb[22].mxu0 }
 0x61d   : > { %v2071_v28 = vpop.f32.mrb[23].mxu0 }
 0x61e   : > { %v1452_v29 = vadd.f32 %v1933_v18, %v1444_v19 }
 0x620   : > { %v1453_v30 = vadd.f32 %v1452_v29, %v2696_v6  ;;  %v2192_v6 = vld [vmem:[%s2667_s26] sm:$0xff]  }
 0x621   : > { %2081 = vmatpush3.bf16.msra.mxu0 %v2192_v6 }
 0x622   : > { %v1456_v31 = vsel %vm735_vm2, %v1453_v30, 0.0  ;;  %2082 = vmatprep.subr.bf16.mxu0 %v2380_v4 }
 0x623   : > { %1457 = vadd.xlane.f32.xlu0 %v1456_v31 }
 0x625   : > { %2083 = vmatpush3.bf16.msra.mxu0 %v2193_v39 }
 0x626   : > { %2084 = vmatprep.subr.bf16.mxu0 %v2380_v4 }
 0x629   : > { %2085 = vmatpush3.bf16.msra.mxu0 %v2194_v50 }
 0x62a   : > { %2086 = vmatprep.subr.bf16.mxu0 %v2380_v4  ;;  %v1940_v4 = vld [vmem:[%s687_s0] ss:$0 sm:$0xff] }
 0x62d   : > { %2087 = vmatpush3.bf16.msra.mxu0 %v2195_v51 }
 0x6b0   : > { %v1458_v32 = vpop.xlane.xlu0 %1457 }
 0x6b1   : > { %v1460_v33 = vmul.f32 0.03125, %v1458_v32 }
 0x6b3   : > { %v1461_v34 = vsub.f32 %v1453_v30, %v1460_v33 }
 0x6b5   : > { %v1462_v35 = vmul.f32 %v1461_v34, %v1461_v34 }
 0x6b7   : > { %v1463_v36 = vsel %vm735_vm2, %v1462_v35, 0.0 }
 0x6b8   : > { %1464 = vadd.xlane.f32.xlu1 %v1463_v36 }
 0x745   : > { %v1465_v40 = vpop.xlane.xlu1 %1464 }
 0x746   : > { %v1466_v41 = vmul.f32 0.03125, %v1465_v40 }
 0x748   : > { %v1467_v42 = vadd.f32 1e-05, %v1466_v41 }
 0x74a   : > { %2212 = vrsqrt.f32 %v1467_v42 }
 0x754   : > { %v2213_v43 = vpop.eup %2212 }
 0x755   : > { %v1469_v45 = vmul.f32 %v2213_v43, %v1461_v34 }
 0x757   : > { %v1476_v47 = vmul.f32 %v1934_v44, %v1469_v45 }
 0x759   : > { %v1483_v48 = vadd.f32 %v1935_v46, %v1476_v47 }
 0x75b   : > { %v1484_v49 = vpack.c.bf16 %v1483_v48, %v1483_v48 }
 0x75d   : > { %2077 = vmatmul.mubr.msk.bf16.vlgmr.msra.gmra.mrb[28].mxu1 %vm735_vm2, %v1484_v49 }
 0x830   : > { %v1545_v53 = vpop.f32.mrb[28].mxu1 }
 0x831   : > { %v1546_v54 = vadd.f32 %v1936_v52, %v1545_v53  ;;  %v2078_v55 = vpop.f32.mrb[29].mxu1 }
 0x832   : > { %v1548_v56 = vpop.f32.mrb[30].mxu1 }
 0x833   : > { %v1551_v57 = vmax.f32 %v1546_v54, 0.0  ;;  %v2079_v58 = vpop.f32.mrb[31].mxu1 }
 0x835   : > { %v1552_v59 = vpack.c.bf16 %v1551_v57, %v1551_v57 }
 0x837   : > { %2089 = vmatmul.mubr.msk.bf16.vlgmr.msra.gmra.mrb[24].mxu0 %vm1592_vm5, %v1552_v59 }
 0x90a   : > { %v1630_v60 = vpop.f32.mrb[24].mxu0 }
 0x90b   : > { %v1631_v61 = vadd.f32 %v1940_v4, %v1630_v60  ;;  %v2090_v62 = vpop.f32.mrb[25].mxu0 }
 0x90c   : > { %v1633_v63 = vpop.f32.mrb[26].mxu0 }
 0x90d   : > { %v2091_v0 = vpop.f32.mrb[27].mxu0  ;;  %v1636_v1 = vadd.f32 %v1631_v61, %v1483_v48 }
 0x90f   : > { %v1639_v2 = vsel %vm735_vm2, %v1636_v1, 0.0 }
 0x910   : > { %1640 = vadd.xlane.f32.xlu0 %v1639_v2 }
 0x99d   : > { %v1641_v3 = vpop.xlane.xlu0 %1640 }
 0x99e   : > { %v1642_v5 = vmul.f32 0.03125, %v1641_v3 }
 0x9a0   : > { %v1643_v7 = vsub.f32 %v1636_v1, %v1642_v5 }
 0x9a2   : > { %v1644_v8 = vmul.f32 %v1643_v7, %v1643_v7 }
 0x9a4   : > { %v1645_v9 = vsel %vm735_vm2, %v1644_v8, 0.0 }
 0x9a5   : > { %1646 = vadd.xlane.f32.xlu0 %v1645_v9 }
 0xa32   : > { %v1647_v10 = vpop.xlane.xlu0 %1646 }
 0xa33   : > { %v1648_v11 = vmul.f32 0.03125, %v1647_v10 }
 0xa35   : > { %v1649_v12 = vadd.f32 1e-05, %v1648_v11 }
 0xa37   : > { %2214 = vrsqrt.f32 %v1649_v12 }
 0xa41   : > { %v2215_v13 = vpop.eup %2214 }
 0xa42   : > { %v1651_v15 = vmul.f32 %v2215_v13, %v1643_v7  ;;  %1670 = sbr.rel (%p1948_p12) target bundleno = 2633 (0xa49), region = 92 }
 0xa44   : > { %v1658_v17 = vmul.f32 %v1946_v14, %v1651_v15 }
 0xa46   : > { %v1665_v20 = vadd.f32 %v1947_v16, %v1658_v17 }
 0xa48   : > { %1666 = vst.msk [vmem:[#allocation2] sm:$0xff] %vm735_vm2, %v1665_v20  ;;  %1671 = vst.msk [vmem:[%s2689_s8] sm:$0xff] (!%p1948_p12), %vm735_vm2, %v1665_v20 }
 0xa49 PF: > { %s3004_s17 = sld [smem:[#allocation15_spill]]  ;;  %s3005_s22 = sld [smem:[#allocation24_spill]] }
 0xa4a   : > { %s3007_s1 = sld [smem:[#allocation36_spill]]  ;;  %s1686_s19 = sshll.u32 %s2689_s8, 4  ;;  %s1687_s19 = int_to_ptr.vmem [resolvable:$true] %s1686_s19 }
 0xa4b   : > { %s2274_s30 = scalar_lea.vmem %s1687_s19, 128  ;;  %s2387_s16 = smov [#allocation8]  }
 0xa4c   : > { %p2275_p13 = scmp.ne.s32.totalorder %s1687_s19, %s2274_s30  ;;  %s2278_s25 = sshll.u32 %s2387_s16, 4  ;;  %s2279_s25 = int_to_ptr.vmem [resolvable:$false] %s2278_s25 }
 0xa4d   : > { %s2280_s27 = scalar_lea.vmem %s2279_s25, 256  ;;  %p2281_p7 = scmp.lt.s32.totalorder %s1687_s19, %s2279_s25 }
 0xa4e   : > { %p2276_p10 = pnand %p2275_p13, %p2566_p6  ;;  %p2282_p11 = scmp.lt.s32.totalorder %s2280_s27, %s2274_s30 }
 0xa4f   : > { %s1950_s11 = sshll.u32 %s3004_s17, 7  ;;  %s1673_s15 = scalar_lea.sflag [#allocation5], %s3005_s22 }
 0xa50   : > { %s2867_s21 = scalar_lea.hbm %s3007_s1, %s1950_s11  ;;  %p2277_p3 = pneg %p2276_p10 }
 0xa51   : > { %p2283_p1 = por %p2282_p11, %p2281_p7 }
 0xa53   : > { %p2284_p2 = pnand %p2283_p1, %p2277_p3 }
 0xa55   : > { %2287 = shalt.err (!%p2284_p2)
}
 0xa56   : > { %s2288_s8 = scalar_lea.hbm %s2867_s21, 128  ;;  %s2292_s29 = scalar_lea.hbm %s3007_s1, 256 }
 0xa57   : > { %p2289_p9 = scmp.ne.s32.totalorder %s2867_s21, %s2288_s8  ;;  %p2293_p0 = scmp.lt.u32.totalorder %s2867_s21, %s3007_s1 }
 0xa58   : > { %p2294_p8 = scmp.lt.u32.totalorder %s2292_s29, %s2288_s8  ;;  %p2296_p13 = scmp.lt.u32.totalorder %s2288_s8, %s2867_s21 }
 0xa59   : > { %p2290_p5 = pnand %p2289_p9, %p2566_p6 }
 0xa5a   : > { %p2295_p12 = por %p2294_p8, %p2293_p0 }
 0xa5b   : > { %p2291_p4 = pneg %p2290_p5 }
 0xa5c   : > { %p2297_p10 = por %p2296_p13, %p2295_p12 }
 0xa5e   : > { %p2298_p3 = pnand %p2297_p10, %p2291_p4 }
 0xa60   : > { %2301 = shalt.err (!%p2298_p3)
}
 0xa61   : > { %2098 = dma.vmem_to_hbm [thread:$0]  (%p2566_p6), %s1687_s19, 128, %s2867_s21, %s1673_s15  }
 0xa62 PF: > { %s3008_s14 = sld [smem:[#allocation18_spill]]  ;;  %s3009_s6 = sld [smem:[#allocation12_spill]] }
 0xa63   : > { %s3010_s26 = sld [smem:[#allocation19_spill]] }
 0xa68   : > { %p2115_p7 = scmp.ge.s32.totalorder %s3008_s14, 2  ;;  %s1698_s0 = sand.u32 1, %s3009_s6  }
 0xa69   : > { %p3011_p11 = scmp.ne.s32.totalorder %s3010_s26, 0  ;;  %s1699_s7 = scalar_lea.sflag [#allocation5], %s1698_s0 }
 0xa6b   : > { %p2109_p1 = pnand %p2115_p7, %p3011_p11 }
 0xa6d   : > { %2343 = dma.done.wait (!%p2109_p1), %s1699_s7, 128  }
 0xa6e   : > { %2345 = vsyncadd (!%p2109_p1), %s1699_s7, 4294967168  ;;  %s31_s20 = sadd.s32 1, %s3008_s14   ;;  %s3012_s29 = sld [smem:[#allocation13_spill]] }
 0xa6f   : > { %p28_p2 = scmp.ge.s32.totalorder %s31_s20, 6   ;;  %s3013_s30 = sld [smem:[#allocation14_spill]] }
 0xa70   : > { %s3014_s15 = sld [smem:[#allocation23_spill]]  ;;  %s3015_s16 = sld [smem:[#allocation16_spill]] }
 0xa71   : > { %s3016_s17 = sld [smem:[#allocation17_spill]]  ;;  %s3017_s18 = sld [smem:[#allocation20_spill]] }
 0xa72   : > { %s3018_s19 = sld [smem:[#allocation22_spill]]  ;;  %30 = sbr.rel (!%p28_p2) target bundleno = 21 (0x15), region = 169 }
 0xa79   :  { %1704 = vsyncpa [#allocation4], 1 }
 0xa7a   :  { %1706 = vsyncpa [#allocation4 + $0x1], 1 }
 0xa7b   :  { %1707 = vsyncpa [#allocation7], 1 }
 0xa7c   :  { %1708 = vsyncpa [#allocation5], 1 }
 0xa7d   :  { %1710 = vsyncpa [#allocation5 + $0x1], 1 }

</bundles_post_ra>
